<compile_context>
chip_gen: v6e
topology: v6e:2x2x1
jax: 0.10.0
libtpu: 0.0.40
codegen_flags: <defaults>
</compile_context>

<pallas_src>
import functools
import math

import jax
import jax.numpy as jnp
from jax.experimental import pallas as pl
from jax.experimental.pallas import tpu as pltpu


def _mixloss_row_kernel(logits_ref, t1_ref, t2_ref, lam_ref, loss_ref,
                        *, eps, n_class):
    """Per-row MixLoss: loss_ref[r, 0] = KL(true_dist_r || softmax(logits_r))."""
    logits = logits_ref[...].astype(jnp.float32)                  # (TB, C)
    t1 = t1_ref[...]                                              # (TB, 1) int32
    t2 = t2_ref[...]                                              # (TB, 1) int32
    lam = lam_ref[...]                                            # (TB, 1) f32

    # log-sum-exp along classes (only remaining full-tile transcendental work).
    m = jnp.max(logits, axis=-1, keepdims=True)                   # (TB, 1)
    lse = m + jnp.log(jnp.sum(jnp.exp(logits - m), axis=-1, keepdims=True))

    base = float(eps) / n_class            # trace-time constants
    peak = 1.0 - float(eps)

    # One-hot masks, built once and reused for both target gathers.
    iota = jax.lax.broadcasted_iota(jnp.int32, logits.shape, 1)   # (TB, C)
    oh1 = iota == t1
    oh2 = iota == t2

    # Logits gathered at the target indices (per row).
    z1 = jnp.sum(jnp.where(oh1, logits, 0.0), axis=-1, keepdims=True)   # (TB,1)
    z2 = jnp.sum(jnp.where(oh2, logits, 0.0), axis=-1, keepdims=True)   # (TB,1)

    # cross = sum_c t * log_softmax(logits)_c
    #       = base*sum_c logits + peak*(lam*z1 + (1-lam)*z2) - lse*(base*C + peak)
    # and base*C + peak == eps + (1 - eps) == 1.
    spike_cross = peak * (lam * z1 + (1.0 - lam) * z2)
    if base > 0.0:
        cross = base * jnp.sum(logits, axis=-1, keepdims=True) + spike_cross - lse
    else:
        cross = spike_cross - lse

    # ent = sum_c xlogy(t, t): closed form, only per-row logs needed.
    xlogy_base = base * math.log(base) if base > 0.0 else 0.0      # const
    v_same = base + peak                                           # const > 0
    xlogy_same = v_same * math.log(v_same) if v_same > 0.0 else 0.0
    ent_same = (n_class - 1) * xlogy_base + xlogy_same             # const

    v1 = base + peak * lam                                         # (TB, 1)
    v2 = base + peak * (1.0 - lam)                                 # (TB, 1)
    if eps > 0.0:
        # base > 0 => v1, v2 > 0; no guards needed.
        xl1 = v1 * jnp.log(v1)
        xl2 = v2 * jnp.log(v2)
    else:
        # eps == 0: v1/v2 may be exactly 0 (lam in {0, 1}); xlogy(0, 0) = 0.
        xl1 = jnp.where(v1 > 0.0, v1 * jnp.log(jnp.where(v1 > 0.0, v1, 1.0)), 0.0)
        xl2 = jnp.where(v2 > 0.0, v2 * jnp.log(jnp.where(v2 > 0.0, v2, 1.0)), 0.0)
    ent_diff = (n_class - 2) * xlogy_base + xl1 + xl2              # (TB, 1)

    same = t1 == t2                                                # (TB, 1) bool
    ent = jnp.where(same, jnp.float32(ent_same), ent_diff)         # (TB, 1)

    loss_ref[...] = ent - cross


def mix_loss(output, target1, target2, interpolation,
             *, eps=0.0, reduction="mean", tile_b=None):
    """Pallas TPU implementation of MixLoss.forward.

    output:        (B, C) float logits (native dtype; bf16/f32 both fine)
    target1/2:     (B,)   int class indices
    interpolation: scalar or (B,) mixup coefficient
    """
    if reduction not in ("none", "mean", "sum"):
        raise ValueError(f"unknown reduction: {reduction}")

    B, C = output.shape
    t1 = jnp.asarray(target1, jnp.int32).reshape(B, 1)
    t2 = jnp.asarray(target2, jnp.int32).reshape(B, 1)
    lam = jnp.broadcast_to(
        jnp.asarray(interpolation, jnp.float32).reshape(-1, 1), (B, 1))

    # Batch tile size: ~2 MiB of f32 logits per block. With double-buffered
    # inputs plus a handful of live (tile_b, C) f32 intermediates this stays
    # comfortably under the default scoped VMEM on v5e/v6e/v7x (v7x: 64 MiB
    # physical / 32 MiB scoped).
    if tile_b is None:
        tile_b = max(8, (2 * 1024 * 1024) // (C * 4))
    tile_b = min(tile_b, B)
    if B >= 8:
        tile_b = max(8, (tile_b // 8) * 8)
    num_tiles = pl.cdiv(B, tile_b)

    kernel = functools.partial(_mixloss_row_kernel, eps=float(eps), n_class=C)

    per_row = pl.pallas_call(
        kernel,
        out_shape=jax.ShapeDtypeStruct((B, 1), jnp.float32),
        grid_spec=pltpu.PrefetchScalarGridSpec(
            num_scalar_prefetch=0,
            grid=(num_tiles,),
            in_specs=[
                pl.BlockSpec((tile_b, C), lambda i: (i, 0)),   # logits
                pl.BlockSpec((tile_b, 1), lambda i: (i, 0)),   # target1
                pl.BlockSpec((tile_b, 1), lambda i: (i, 0)),   # target2
                pl.BlockSpec((tile_b, 1), lambda i: (i, 0)),   # interpolation
            ],
            out_specs=pl.BlockSpec((tile_b, 1), lambda i: (i, 0)),
        ),
        compiler_params=pltpu.CompilerParams(
            dimension_semantics=("parallel",)),
    )(output, t1, t2, lam)[:, 0]

    if reduction == "none":
        return per_row
    total = jnp.sum(per_row)
    if reduction == "mean":
        total = total / float(B)   # module semantics: divide by batch size
    return total


def _reference(output, target1, target2, interpolation, eps, reduction):
    """Pure-JAX reference mirroring the PyTorch module (elementwise xlogy path)."""
    B, C = output.shape
    logp = jax.nn.log_softmax(output.astype(jnp.float32), axis=-1)
    base = eps / C
    peak = 1.0 - eps
    oh1 = base + peak * jax.nn.one_hot(target1, C, dtype=jnp.float32)
    oh2 = base + peak * jax.nn.one_hot(target2, C, dtype=jnp.float32)
    lam = jnp.broadcast_to(
        jnp.asarray(interpolation, jnp.float32).reshape(-1, 1), (B, 1))
    t = lam * oh1 + (1.0 - lam) * oh2
    kl = jnp.where(t > 0, t * jnp.log(jnp.where(t > 0, t, 1.0)), 0.0) - t * logp
    if reduction == "none":
        return kl.sum(-1)
    s = kl.sum()
    return s / B if reduction == "mean" else s


if __name__ == "__main__":
    key = jax.random.PRNGKey(0)
    k1, k2, k3, k4 = jax.random.split(key, 4)

    B, C = 8, 16                      # batch=8, n_class=16
    logits = jax.random.normal(k1, (B, C), dtype=jnp.float32)
    target1 = jax.random.randint(k2, (B,), 0, C, dtype=jnp.int32)
    target2 = jax.random.randint(k3, (B,), 0, C, dtype=jnp.int32)
    interpolation = jax.random.uniform(k4, (B,), dtype=jnp.float32)

    # Exercise the t1 == t2 closed-form branch and the lam == 0 guard path.
    target2 = target2.at[0].set(target1[0])
    interpolation = interpolation.at[1].set(0.0)

    for eps in (0.1, 0.0):
        for reduction in ("mean", "sum", "none"):
            got = jax.block_until_ready(
                mix_loss(logits, target1, target2, interpolation,
                         eps=eps, reduction=reduction))
            want = _reference(logits, target1, target2, interpolation,
                              eps, reduction)
            assert jnp.allclose(got, want, rtol=1e-5, atol=1e-4), (
                eps, reduction, got, want)

    print("KERNEL_OK")
</pallas_src>

<mosaic_0001>
module attributes {stable_mosaic.version = 11 : i64} {
  func.func @_mixloss_row_kernel(%arg0: i32, %arg1: memref<8x16xf32, #tpu.memory_space<vmem>>, %arg2: memref<8x1xi32, #tpu.memory_space<vmem>>, %arg3: memref<8x1xi32, #tpu.memory_space<vmem>>, %arg4: memref<8x1xf32, #tpu.memory_space<vmem>>, %arg5: memref<8x1xf32, #tpu.memory_space<vmem>>) attributes {dimension_semantics = [#tpu.dimension_semantics<parallel>], iteration_bounds = array<i64: 1>, scalar_prefetch = 0 : i64, scratch_operands = 0 : i64, tpu.core_type = #tpu.core_type<tc>, window_params = [{transform_indices = @transform_0, window_bounds = array<i64: 8, 16>}, {transform_indices = @transform_1, window_bounds = array<i64: 8, 1>}, {transform_indices = @transform_2, window_bounds = array<i64: 8, 1>}, {transform_indices = @transform_3, window_bounds = array<i64: 8, 1>}, {transform_indices = @transform_4, window_bounds = array<i64: 8, 1>}]} {
    %c0 = arith.constant 0 : index
    %c0_0 = arith.constant 0 : index
    %0 = vector.load %arg1[%c0, %c0_0] : memref<8x16xf32, #tpu.memory_space<vmem>>, vector<8x16xf32>
    %c0_1 = arith.constant 0 : index
    %c0_2 = arith.constant 0 : index
    %1 = vector.load %arg2[%c0_1, %c0_2] : memref<8x1xi32, #tpu.memory_space<vmem>>, vector<8x1xi32>
    %c0_3 = arith.constant 0 : index
    %c0_4 = arith.constant 0 : index
    %2 = vector.load %arg3[%c0_3, %c0_4] : memref<8x1xi32, #tpu.memory_space<vmem>>, vector<8x1xi32>
    %c0_5 = arith.constant 0 : index
    %c0_6 = arith.constant 0 : index
    %3 = vector.load %arg4[%c0_5, %c0_6] : memref<8x1xf32, #tpu.memory_space<vmem>>, vector<8x1xf32>
    %cst = arith.constant dense<0xFF800000> : vector<8xf32>
    %4 = vector.multi_reduction <maximumf>, %0, %cst [1] : vector<8x16xf32> to vector<8xf32>
    %5 = vector.shape_cast %4 : vector<8xf32> to vector<8x1xf32>
    %6 = vector.broadcast %5 : vector<8x1xf32> to vector<8x16xf32>
    %7 = arith.subf %0, %6 : vector<8x16xf32>
    %8 = math.exp %7 : vector<8x16xf32>
    %cst_7 = arith.constant dense<0.000000e+00> : vector<8xf32>
    %9 = vector.multi_reduction <add>, %8, %cst_7 [1] : vector<8x16xf32> to vector<8xf32>
    %10 = vector.shape_cast %9 : vector<8xf32> to vector<8x1xf32>
    %11 = math.log %10 : vector<8x1xf32>
    %12 = arith.addf %5, %11 : vector<8x1xf32>
    %13 = tpu.iota {dimensions = array<i32: 1>} : vector<8x16xi32>
    %14 = vector.broadcast %1 : vector<8x1xi32> to vector<8x16xi32>
    %15 = arith.cmpi eq, %13, %14 : vector<8x16xi32>
    %16 = vector.broadcast %2 : vector<8x1xi32> to vector<8x16xi32>
    %17 = arith.cmpi eq, %13, %16 : vector<8x16xi32>
    %cst_8 = arith.constant 0.000000e+00 : f32
    %18 = vector.broadcast %cst_8 : f32 to vector<8x16xf32>
    %19 = arith.select %15, %0, %18 : vector<8x16xi1>, vector<8x16xf32>
    %cst_9 = arith.constant dense<0.000000e+00> : vector<8xf32>
    %20 = vector.multi_reduction <add>, %19, %cst_9 [1] : vector<8x16xf32> to vector<8xf32>
    %21 = vector.shape_cast %20 : vector<8xf32> to vector<8x1xf32>
    %cst_10 = arith.constant 0.000000e+00 : f32
    %22 = vector.broadcast %cst_10 : f32 to vector<8x16xf32>
    %23 = arith.select %17, %0, %22 : vector<8x16xi1>, vector<8x16xf32>
    %cst_11 = arith.constant dense<0.000000e+00> : vector<8xf32>
    %24 = vector.multi_reduction <add>, %23, %cst_11 [1] : vector<8x16xf32> to vector<8xf32>
    %25 = vector.shape_cast %24 : vector<8xf32> to vector<8x1xf32>
    %26 = arith.mulf %3, %21 : vector<8x1xf32>
    %cst_12 = arith.constant 1.000000e+00 : f32
    %27 = vector.broadcast %cst_12 : f32 to vector<8x1xf32>
    %28 = arith.subf %27, %3 : vector<8x1xf32>
    %29 = arith.mulf %28, %25 : vector<8x1xf32>
    %30 = arith.addf %26, %29 : vector<8x1xf32>
    %cst_13 = arith.constant 0.899999976 : f32
    %31 = vector.broadcast %cst_13 : f32 to vector<8x1xf32>
    %32 = arith.mulf %31, %30 : vector<8x1xf32>
    %cst_14 = arith.constant dense<0.000000e+00> : vector<8xf32>
    %33 = vector.multi_reduction <add>, %0, %cst_14 [1] : vector<8x16xf32> to vector<8xf32>
    %34 = vector.shape_cast %33 : vector<8xf32> to vector<8x1xf32>
    %cst_15 = arith.constant 6.250000e-03 : f32
    %35 = vector.broadcast %cst_15 : f32 to vector<8x1xf32>
    %36 = arith.mulf %35, %34 : vector<8x1xf32>
    %37 = arith.addf %36, %32 : vector<8x1xf32>
    %38 = arith.subf %37, %12 : vector<8x1xf32>
    %cst_16 = arith.constant 0.899999976 : f32
    %39 = vector.broadcast %cst_16 : f32 to vector<8x1xf32>
    %40 = arith.mulf %39, %3 : vector<8x1xf32>
    %cst_17 = arith.constant 6.250000e-03 : f32
    %41 = vector.broadcast %cst_17 : f32 to vector<8x1xf32>
    %42 = arith.addf %41, %40 : vector<8x1xf32>
    %cst_18 = arith.constant 1.000000e+00 : f32
    %43 = vector.broadcast %cst_18 : f32 to vector<8x1xf32>
    %44 = arith.subf %43, %3 : vector<8x1xf32>
    %cst_19 = arith.constant 0.899999976 : f32
    %45 = vector.broadcast %cst_19 : f32 to vector<8x1xf32>
    %46 = arith.mulf %45, %44 : vector<8x1xf32>
    %cst_20 = arith.constant 6.250000e-03 : f32
    %47 = vector.broadcast %cst_20 : f32 to vector<8x1xf32>
    %48 = arith.addf %47, %46 : vector<8x1xf32>
    %49 = math.log %42 : vector<8x1xf32>
    %50 = arith.mulf %42, %49 : vector<8x1xf32>
    %51 = math.log %48 : vector<8x1xf32>
    %52 = arith.mulf %48, %51 : vector<8x1xf32>
    %cst_21 = arith.constant -0.4440777 : f32
    %53 = vector.broadcast %cst_21 : f32 to vector<8x1xf32>
    %54 = arith.addf %53, %50 : vector<8x1xf32>
    %55 = arith.addf %54, %52 : vector<8x1xf32>
    %56 = arith.cmpi eq, %1, %2 : vector<8x1xi32>
    %cst_22 = arith.constant -0.565008879 : f32
    %57 = vector.broadcast %cst_22 : f32 to vector<8x1xf32>
    %58 = arith.select %56, %57, %55 : vector<8x1xi1>, vector<8x1xf32>
    %59 = arith.subf %58, %38 : vector<8x1xf32>
    %c0_23 = arith.constant 0 : index
    %c0_24 = arith.constant 0 : index
    %60 = vector.load %arg5[%c0_23, %c0_24] : memref<8x1xf32, #tpu.memory_space<vmem>>, vector<8x1xf32>
    tpu.vector_store %arg5[%c0_23, %c0_24], %59 {strides = array<i32>} : memref<8x1xf32, #tpu.memory_space<vmem>>, vector<8x1xf32>,
    return
  }
  func.func @transform_0(%arg0: i32) -> (i32, i32) {
    %c0_i32 = arith.constant 0 : i32
    %c0_i32_0 = arith.constant 0 : i32
    return %arg0, %c0_i32 : i32, i32
  }
  func.func @transform_1(%arg0: i32) -> (i32, i32) {
    %c0_i32 = arith.constant 0 : i32
    %c0_i32_0 = arith.constant 0 : i32
    return %arg0, %c0_i32 : i32, i32
  }
  func.func @transform_2(%arg0: i32) -> (i32, i32) {
    %c0_i32 = arith.constant 0 : i32
    %c0_i32_0 = arith.constant 0 : i32
    return %arg0, %c0_i32 : i32, i32
  }
  func.func @transform_3(%arg0: i32) -> (i32, i32) {
    %c0_i32 = arith.constant 0 : i32
    %c0_i32_0 = arith.constant 0 : i32
    return %arg0, %c0_i32 : i32, i32
  }
  func.func @transform_4(%arg0: i32) -> (i32, i32) {
    %c0_i32 = arith.constant 0 : i32
    %c0_i32_0 = arith.constant 0 : i32
    return %arg0, %c0_i32 : i32, i32
  }
}

</mosaic_0001>

<bundles_post_ra>
// kernel: tpu_custom_call.1
= control target key start
LH: loop header
LB: loop body
LE: loop exit
PB: predicated region body
PF: predicated region fallthrough
CT: control target
= control target key end

     0   :  { %vm21_vm0 = vcmask 130048   ;;  %v95_v1 = vmov 0   ;;  %v34_v9 = vlaneseq  ;;  %vm78_vm4 = vcmask 7168   ;;  %s142_s0 = inlined_call_operand.vmem [shape: f32[8,16], index: 0, kind: input, shape index: {}]   ;;  %s143_s1 = inlined_call_operand.vmem [shape: s32[8,1], index: 1, kind: input, shape index: {}]   ;;  %s144_s2 = inlined_call_operand.vmem [shape: s32[8,1], index: 2, kind: input, shape index: {}]   ;;  %s145_s3 = inlined_call_operand.vmem [shape: f32[8,1], index: 3, kind: input, shape index: {}]   ;;  %s146_s4 = inlined_call_operand.vmem [shape: f32[8,1], index: 4, kind: output, shape index: {}]  }
   0x1   :  { %v17_v0 = vld [vmem:[%s142_s0] sm:$0xff]  ;;  %85 = vset.pattern.permute.xlu0 %v95_v1  ;;  %86 = vset.pattern.permute.xlu1 %v95_v1 }
   0x2   :  { %v18_v2 = vld [vmem:[%s143_s1] sm:$0xff]  ;;  %v22_v4 = vsel %vm21_vm0, %v17_v0, -inf  ;;  %v57_v5 = vsel %vm21_vm0, %v17_v0, 0.0  ;;  %v35_v10 = vand.u32 127, %v34_v9 }
   0x3   :  { %v19_v3 = vld [vmem:[%s144_s2] sm:$0xff]  ;;  %23 = vmax.xlane.f32.xlu0 %v22_v4 }
   0x4   :  { %41 = vperm.xlu1 %86, %v19_v3   ;;  %vm75_vm1 = vcmp.eq.s32.totalorder %v18_v2, %v19_v3  ;;  %v20_v19 = vld [vmem:[%s145_s3] sm:$0xff] }
   0x5   :  { %v53_v20 = vsub.f32 1.0, %v20_v19  ;;  %v63_v21 = vmul.f32 0.9, %v20_v19 }
   0x7   :  { %v64_v22 = vadd.f32 0.00625, %v63_v21  ;;  %v65_v23 = vmul.f32 0.9, %v53_v20 }
   0x9   :  { %v66_v24 = vadd.f32 0.00625, %v65_v23 }
  0x19   :  { %37 = vperm.xlu0 %85, %v18_v2  }
  0x38   :  { %58 = vadd.xlane.f32.xlu0 %v57_v5 }
  0x7f   :  { %v42_v12 = vpop.permute.xlu1 %41 }
  0x80   :  { %vm43_vm3 = vcmp.eq.s32.totalorder %v35_v10, %v42_v12 }
  0x81   :  { %v48_v17 = vsel %vm43_vm3, %v17_v0, 0.0 }
  0x82   :  { %v49_v18 = vsel %vm21_vm0, %v48_v17, 0.0 }
  0x8c   :  { %v24_v6 = vpop.xlane.xlu0 %23 }
  0x8d   :  { %v25_v7 = vsub.f32 %v17_v0, %v24_v6 }
  0x8f   :  { %v26_v8 = vmul.f32 1.442695, %v25_v7 }
  0x91   :  { %87 = vpow2.f32 %v26_v8 }
  0x92   :  { %89 = vlog2.f32 %v64_v22 }
  0x93   :  { %91 = vlog2.f32 %v66_v24 }
  0x94   :  { %v38_v11 = vpop.permute.xlu0 %37 }
  0x95   :  { %vm39_vm2 = vcmp.eq.s32.totalorder %v35_v10, %v38_v11 }
  0x96   :  { %v44_v14 = vsel %vm39_vm2, %v17_v0, 0.0 }
  0x97   :  { %v45_v16 = vsel %vm21_vm0, %v44_v14, 0.0 }
  0x9e   :  { %v88_v13 = vpop.eup %87 }
  0x9f   :  { %v28_v15 = vsel %vm21_vm0, %v88_v13, 0.0  ;;  %v90_v25 = vpop.eup %89 }
  0xa0   :  { %29 = vadd.xlane.f32.xlu1 %v28_v15  ;;  %v68_v27 = vmul.f32 0.6931472, %v90_v25  ;;  %v92_v28 = vpop.eup %91 }
  0xa1   :  { %v71_v31 = vmul.f32 0.6931472, %v92_v28 }
  0xa2   :  { %v69_v30 = vmul.f32 %v68_v27, %v64_v22 }
  0xa3   :  { %v72_v35 = vmul.f32 %v71_v31, %v66_v24 }
  0xa4   :  { %46 = vadd.xlane.f32.xlu1 %v45_v16  ;;  %v73_v36 = vadd.f32 -0.4440777, %v69_v30 }
  0xa6   :  { %v74_v42 = vadd.f32 %v73_v36, %v72_v35 }
  0xa8   :  { %50 = vadd.xlane.f32.xlu1 %v49_v18  ;;  %v76_v46 = vsel %vm75_vm1, -0.5650089, %v74_v42 }
  0xc1   :  { %v59_v37 = vpop.xlane.xlu0 %58 }
  0xc2   :  { %v60_v40 = vmul.f32 0.00625, %v59_v37 }
 0x129   :  { %v30_v26 = vpop.xlane.xlu1 %29 }
 0x12a   :  { %93 = vlog2.f32 %v30_v26 }
 0x12d   :  { %v47_v29 = vpop.xlane.xlu1 %46 }
 0x12e   :  { %v52_v33 = vmul.f32 %v47_v29, %v20_v19 }
 0x131   :  { %v51_v32 = vpop.xlane.xlu1 %50 }
 0x132   :  { %v54_v34 = vmul.f32 %v53_v20, %v51_v32 }
 0x134   :  { %v55_v38 = vadd.f32 %v54_v34, %v52_v33 }
 0x136   :  { %v56_v39 = vmul.f32 0.9, %v55_v38 }
 0x137   :  { %v94_v41 = vpop.eup %93 }
 0x138   :  { %v32_v43 = vmul.f32 0.6931472, %v94_v41  ;;  %v61_v45 = vadd.f32 %v60_v40, %v56_v39 }
 0x13a   :  { %v33_v44 = vadd.f32 %v32_v43, %v24_v6 }
 0x13c   :  { %v62_v47 = vsub.f32 %v61_v45, %v33_v44 }
 0x13e   :  { %v77_v48 = vsub.f32 %v76_v46, %v62_v47 }
 0x140   :  { %79 = vst.msk [vmem:[%s146_s4] sm:$0xff] %vm78_vm4, %v77_v48 }

</bundles_post_ra>
